<compile_context>
chip_gen: v7x
topology: tpu7x:2x2x1
jax: 0.10.0
libtpu: 0.0.40
codegen_flags: <defaults>
</compile_context>

<pallas_src>
import functools
import math

import numpy as np
import jax
import jax.numpy as jnp
from jax.experimental import pallas as pl
from jax.experimental.pallas import tpu as pltpu


# ----------------------------- VMEM budgeting -------------------------------

def _tpu_vmem_bytes():
    try:
        return int(pltpu.get_tpu_info().vmem_capacity_bytes)
    except Exception:
        return 64 * 1024 * 1024  # conservative (v7x per-TC VMEM)


def _vmem_limit_bytes(cap):
    # Raise the scoped-VMEM cap above the 16/32 MiB default on 128 MiB parts,
    # keep headroom on v7x (64 MiB physical).
    return max(32 * 1024 * 1024, int(cap * 0.7))


def _round_up(x, m):
    return ((x + m - 1) // m) * m


def _pick_tm(m_rows, k, d, budget, cap=1024):
    """Row-tile for the feature linear: double-buffered in/out f32 blocks + resident bf16
    weight must fit `budget`; keep >=2 grid steps so both v7x TensorCores get work."""
    weight_bytes = k * d * 2
    fit = max(8, (budget - weight_bytes) // (8 * (k + d + 1)))
    tm = min(cap, _round_up(min(fit, m_rows), 8))
    tm = min(tm, max(8, _round_up(pl.cdiv(m_rows, 2), 8)))
    return max(8, (tm // 8) * 8)


# ----------------------------- Pallas kernels -------------------------------

def _feature_enc_kernel(x_ref, w_ref, b_ref, ew_ref, eb_ref, h_ref, a_ref):
    # h = x @ W + b (bf16 MXU, f32 acc); score = sigmoid(sum_d h*enc_w + enc_b) on the VPU.
    x = x_ref[...].astype(jnp.bfloat16)
    h = jnp.dot(x, w_ref[...], preferred_element_type=jnp.float32) + b_ref[...]
    h_ref[...] = h.astype(h_ref.dtype)
    # enc score as a lane reduction (avoids an N=1 MXU matmul).
    s = jnp.sum(h * ew_ref[...], axis=-1, keepdims=True) + eb_ref[...]
    a_ref[...] = jax.nn.sigmoid(s).astype(a_ref.dtype)
    # NOTE: the (tm, 1) score store is masked/lane-sparse, but it is only B*N*4 bytes total.


def feature_enc_pallas(x2d, w_bf16, b, ew_row, eb):
    m_rows, k = x2d.shape
    d = w_bf16.shape[1]
    cap = _tpu_vmem_bytes()
    tm = _pick_tm(m_rows, k, d, int(cap * 0.4))
    return pl.pallas_call(
        _feature_enc_kernel,
        out_shape=(jax.ShapeDtypeStruct((m_rows, d), jnp.float32),
                   jax.ShapeDtypeStruct((m_rows, 1), jnp.float32)),
        grid=(pl.cdiv(m_rows, tm),),
        in_specs=[
            pl.BlockSpec((tm, k), lambda i: (i, 0)),
            pl.BlockSpec((k, d), lambda i: (0, 0)),   # resident bf16 weight
            pl.BlockSpec((1, d), lambda i: (0, 0)),
            pl.BlockSpec((1, d), lambda i: (0, 0)),
            pl.BlockSpec((1, 1), lambda i: (0, 0)),
        ],
        out_specs=[pl.BlockSpec((tm, d), lambda i: (i, 0)),
                   pl.BlockSpec((tm, 1), lambda i: (i, 0))],
        compiler_params=pltpu.CompilerParams(
            dimension_semantics=("parallel",),
            vmem_limit_bytes=_vmem_limit_bytes(cap)),
    )(x2d, w_bf16, b.reshape(1, d), ew_row, eb.reshape(1, 1))


def _cnn_block_kernel(h_ref, q_ref, cls_ref, w_ref, b_ref, o_ref, *, Hh, Ww, add_len):
    # Fused: shifted ReLU + wrap pad + zero halo + depthwise 3x3 conv + bias + residual
    # + cls-token prepend.  Works entirely in the flattened (rows, D) layout: each 3x3 tap
    # is a static row-shifted slice of a zero-haloed buffer, with left/right column masks.
    d = h_ref.shape[-1]
    n2 = Hh * Ww
    h = h_ref[0]                                        # (N, D) f32
    q = q_ref[0]                                        # (1, D)
    s = jnp.maximum(h - q, 0.0)                         # shifted ReLU (never hits HBM)
    if add_len > 0:
        s = jnp.concatenate([s, s[:add_len, :]], axis=0)   # wrap-around pad -> (N2, D)
    zpad = jnp.zeros((Ww + 1, d), jnp.float32)
    spad = jnp.concatenate([zpad, s, zpad], axis=0)     # (N2 + 2*Ww + 2, D)

    col = jax.lax.broadcasted_iota(jnp.int32, (n2, 1), 0) % Ww
    not_left = (col > 0).astype(jnp.float32)
    not_right = (col < Ww - 1).astype(jnp.float32)

    wv = w_ref[...]                                     # (9, D) per-channel taps
    acc = s + b_ref[...]                                # residual + bias (no zero-fill)
    # TODO(synk): the 9 row-shifted slices could use pltpu.roll (XLU) to cut VMEM copies.
    for ky in range(3):
        for kx in range(3):
            kk = ky * 3 + kx
            start = (Ww + 1) + (ky - 1) * Ww + (kx - 1)
            tap = spad[start:start + n2, :] * wv[kk:kk + 1, :]
            if kx == 0:
                tap = tap * not_left
            elif kx == 2:
                tap = tap * not_right
            acc = acc + tap

    out = jnp.concatenate([cls_ref[0], acc], axis=0)    # (M, D) = cls row + conv rows
    o_ref[...] = out[None].astype(o_ref.dtype)


def cnn_block_pallas(h3, Q, cls_tok, conv_w9, conv_b, *, Hh, Ww, add_len):
    B, N, D = h3.shape
    M = Hh * Ww + 1
    cap = _tpu_vmem_bytes()
    # TODO(synk): very large bags (N*D*4 approaching VMEM) would need spatial tiling w/ halos.
    return pl.pallas_call(
        functools.partial(_cnn_block_kernel, Hh=Hh, Ww=Ww, add_len=add_len),
        out_shape=jax.ShapeDtypeStruct((B, M, D), jnp.float32),
        grid=(B,),
        in_specs=[
            pl.BlockSpec((1, N, D), lambda b: (b, 0, 0)),
            pl.BlockSpec((1, 1, D), lambda b: (b, 0, 0)),
            pl.BlockSpec((1, 1, D), lambda b: (0, 0, 0)),
            pl.BlockSpec((9, D), lambda b: (0, 0)),
            pl.BlockSpec((1, D), lambda b: (0, 0)),
        ],
        out_specs=pl.BlockSpec((1, M, D), lambda b: (b, 0, 0)),
        compiler_params=pltpu.CompilerParams(
            dimension_semantics=("parallel",),
            vmem_limit_bytes=_vmem_limit_bytes(cap)),
    )(h3, Q, cls_tok, conv_w9, conv_b.reshape(1, D))


def _mab_tail_kernel(q_ref, x_ref, hmT_ref, qw_ref, qb_ref, kw_ref, kb_ref,
                     vw_ref, vb_ref, ow_ref, ob_ref, fw_ref, fb_ref, o_ref, *, dim_v):
    # Whole MAB + classifier per bag: Q/K/V proj, per-head attention, fc_o residual, fc.
    q_in = q_ref[0].astype(jnp.bfloat16)                # (1, D)
    x_in = x_ref[0].astype(jnp.bfloat16)                # (M, D)

    qp = jnp.dot(q_in, qw_ref[...], preferred_element_type=jnp.float32) + qb_ref[...]
    kp = jnp.dot(x_in, kw_ref[...], preferred_element_type=jnp.float32) + kb_ref[...]
    vp = jnp.dot(x_in, vw_ref[...], preferred_element_type=jnp.float32) + vb_ref[...]

    hmT = hmT_ref[...]                                  # (H, D) 0/1 head mask
    # per-head scores with M on the lane axis: s[h, m] = sum_d (hmT[h,d]*qp[d]) * kp[m,d]
    wq = (hmT * qp).astype(jnp.bfloat16)                # (H, D)
    s = jax.lax.dot_general(wq, kp.astype(jnp.bfloat16),
                            dimension_numbers=(((1,), (1,)), ((), ())),
                            preferred_element_type=jnp.float32)
    s = s * (1.0 / math.sqrt(dim_v))                    # (H, M)
    s = s - jnp.max(s, axis=-1, keepdims=True)          # lane-dense softmax over M
    e = jnp.exp(s)
    a = e / jnp.sum(e, axis=-1, keepdims=True)          # (H, M)

    # attention output for every head over all D, then mask-combine (no (M, D) temporary)
    o_all = jnp.dot(a.astype(jnp.bfloat16), vp.astype(jnp.bfloat16),
                    preferred_element_type=jnp.float32)  # (H, D)
    o = qp + jnp.sum(o_all * hmT, axis=0, keepdims=True)  # (1, D)

    # O = O + relu(fc_o(O)); logits = fc(O)
    o = o + jnp.maximum(
        jnp.dot(o.astype(jnp.bfloat16), ow_ref[...],
                preferred_element_type=jnp.float32) + ob_ref[...], 0.0)
    logits = jnp.dot(o.astype(jnp.bfloat16), fw_ref[...],
                     preferred_element_type=jnp.float32) + fb_ref[...]
    o_ref[...] = logits[None].astype(o_ref.dtype)


def mab_tail_pallas(Q, xseq, hmT, qw, qb, kw, kb, vw, vb, ow, ob, fw, fb, *, dim_v):
    B, M, D = xseq.shape
    H = hmT.shape[0]
    C = fw.shape[1]
    cap = _tpu_vmem_bytes()
    return pl.pallas_call(
        functools.partial(_mab_tail_kernel, dim_v=dim_v),
        out_shape=jax.ShapeDtypeStruct((B, 1, C), jnp.float32),
        grid=(B,),
        in_specs=[
            pl.BlockSpec((1, 1, D), lambda b: (b, 0, 0)),  # Q
            pl.BlockSpec((1, M, D), lambda b: (b, 0, 0)),  # xseq
            pl.BlockSpec((H, D), lambda b: (0, 0)),        # head mask (resident)
            pl.BlockSpec((D, D), lambda b: (0, 0)),        # q_w (bf16, resident)
            pl.BlockSpec((1, D), lambda b: (0, 0)),
            pl.BlockSpec((D, D), lambda b: (0, 0)),        # k_w
            pl.BlockSpec((1, D), lambda b: (0, 0)),
            pl.BlockSpec((D, D), lambda b: (0, 0)),        # v_w
            pl.BlockSpec((1, D), lambda b: (0, 0)),
            pl.BlockSpec((D, D), lambda b: (0, 0)),        # o_w
            pl.BlockSpec((1, D), lambda b: (0, 0)),
            pl.BlockSpec((D, C), lambda b: (0, 0)),        # fc_w
            pl.BlockSpec((1, C), lambda b: (0, 0)),
        ],
        out_specs=pl.BlockSpec((1, 1, C), lambda b: (b, 0, 0)),
        compiler_params=pltpu.CompilerParams(
            dimension_semantics=("parallel",),
            vmem_limit_bytes=_vmem_limit_bytes(cap)),
    )(Q, xseq, hmT, qw, qb.reshape(1, D), kw, kb.reshape(1, D),
      vw, vb.reshape(1, D), ow, ob.reshape(1, D), fw, fb.reshape(1, C))


# ------------------------------- forward pass --------------------------------

def fr_mil_forward(x, p, *, num_heads, k_top):
    B, N, in_dim = x.shape
    D = p["feature_w"].shape[1]
    assert D % num_heads == 0, "hidden_dim must be divisible by num_heads"
    bf16 = jnp.bfloat16

    # one-time bf16 weight casts (MXU is bf16-native; accumulation stays f32 in-kernel)
    fw16 = p["feature_w"].astype(bf16)
    qw16, kw16, vw16 = p["q_w"].astype(bf16), p["k_w"].astype(bf16), p["v_w"].astype(bf16)
    ow16, cw16 = p["o_w"].astype(bf16), p["fc_w"].astype(bf16)

    # 1) fused feature linear + enc sigmoid score (h written once, never re-read for score)
    h2d, a2d = feature_enc_pallas(x.reshape(B * N, in_dim), fw16, p["feature_b"],
                                  p["enc_w"].reshape(1, D), p["enc_b"])
    h = h2d.reshape(B, N, D)
    a1 = a2d.reshape(B, N)

    # 2) recalib('max'): mean of the top-k instances by score.
    # TODO(synk): data-dependent sort/gather of top-k instances stays in plain JAX.
    _, idx = jax.lax.top_k(a1, k_top)
    Q = jnp.mean(jnp.take_along_axis(h, idx[:, :, None], axis=1), axis=1, keepdims=True)

    # 3) fused shifted-ReLU / wrap pad / depthwise conv / residual / cls prepend -> xseq
    _H = int(np.ceil(np.sqrt(N)))
    add_len = _H * _H - N
    assert add_len <= N, "wrap-around padding requires _H*_H - N <= N"
    xseq = cnn_block_pallas(h, Q, p["cls_token"], p["conv_w"].reshape(9, D),
                            p["conv_b"], Hh=_H, Ww=_H, add_len=add_len)

    # 4) fused MAB tail (Q/K/V proj + attention + fc_o residual ReLU + classifier)
    ds = D // num_heads
    hmT = (jnp.arange(num_heads)[:, None] ==
           (jnp.arange(D)[None, :] // ds)).astype(jnp.float32)        # (H, D)
    logits = mab_tail_pallas(Q, xseq, hmT, qw16, p["q_b"], kw16, p["k_b"],
                             vw16, p["v_b"], ow16, p["o_b"], cw16, p["fc_b"], dim_v=D)
    return {"logits": logits.reshape(B, -1)}


# --------------------------- pure-JAX reference -------------------------------

def _bdot(a, b):
    # matches the kernels: bf16 operands, f32 accumulation
    return jnp.dot(a.astype(jnp.bfloat16), b.astype(jnp.bfloat16),
                   preferred_element_type=jnp.float32)


def fr_mil_reference(x, p, *, num_heads, k_top):
    B, N, _ = x.shape
    D = p["feature_w"].shape[1]
    h = _bdot(x, p["feature_w"]) + p["feature_b"]
    a1 = jax.nn.sigmoid(h @ p["enc_w"] + p["enc_b"])[..., 0]
    _, idx = jax.lax.top_k(a1, k_top)
    Q = jnp.mean(jnp.take_along_axis(h, idx[:, :, None], axis=1), axis=1, keepdims=True)
    s = jax.nn.relu(h - Q)
    _H = int(np.ceil(np.sqrt(N)))
    add_len = _H * _H - N
    padded = jnp.concatenate([s, s[:, :add_len, :]], axis=1) if add_len > 0 else s
    cls = jnp.broadcast_to(p["cls_token"], (B, 1, D))
    cnn = padded.reshape(B, _H, _H, D)
    conv = jax.lax.conv_general_dilated(
        cnn, p["conv_w"][:, :, None, :], (1, 1), "SAME",
        dimension_numbers=("NHWC", "HWIO", "NHWC"), feature_group_count=D)
    cnn_out = conv + p["conv_b"] + cnn
    xseq = jnp.concatenate([cls, cnn_out.reshape(B, _H * _H, D)], axis=1)
    M = xseq.shape[1]
    Qp = _bdot(Q, p["q_w"]) + p["q_b"]
    Kp = _bdot(xseq, p["k_w"]) + p["k_b"]
    Vp = _bdot(xseq, p["v_w"]) + p["v_b"]
    dsz = D // num_heads
    Qh = Qp.reshape(B, 1, num_heads, dsz).transpose(0, 2, 1, 3)
    Kh = Kp.reshape(B, M, num_heads, dsz).transpose(0, 2, 1, 3)
    Vh = Vp.reshape(B, M, num_heads, dsz).transpose(0, 2, 1, 3)
    A = jax.nn.softmax(
        jnp.einsum('bhqd,bhkd->bhqk', Qh.astype(jnp.bfloat16), Kh.astype(jnp.bfloat16),
                   preferred_element_type=jnp.float32) / np.sqrt(D), axis=-1)
    Oh = Qh + jnp.einsum('bhqk,bhkd->bhqd', A.astype(jnp.bfloat16), Vh.astype(jnp.bfloat16),
                         preferred_element_type=jnp.float32)
    O = Oh.transpose(0, 2, 1, 3).reshape(B, 1, D)
    O = O + jax.nn.relu(_bdot(O, p["o_w"]) + p["o_b"])
    bag = O[:, 0]
    return {"logits": _bdot(bag, p["fc_w"]) + p["fc_b"]}


# ------------------------------- params init ---------------------------------

def init_params(key, in_dim, hidden, num_classes):
    keys = jax.random.split(key, 10)

    def lin(k, fi, fo):
        k1, k2 = jax.random.split(k)
        lim = 1.0 / np.sqrt(fi)
        return (jax.random.uniform(k1, (fi, fo), jnp.float32, -lim, lim),
                jax.random.uniform(k2, (fo,), jnp.float32, -lim, lim))

    p = {}
    p["feature_w"], p["feature_b"] = lin(keys[0], in_dim, hidden)
    p["enc_w"], p["enc_b"] = lin(keys[1], hidden, 1)
    p["cls_token"] = jax.random.normal(keys[2], (1, 1, hidden), jnp.float32) * 0.02
    p["conv_w"] = jax.random.normal(keys[3], (3, 3, hidden), jnp.float32) * 0.1  # (kh, kw, C)
    p["conv_b"] = jnp.zeros((hidden,), jnp.float32)
    p["q_w"], p["q_b"] = lin(keys[4], hidden, hidden)
    p["k_w"], p["k_b"] = lin(keys[5], hidden, hidden)
    p["v_w"], p["v_b"] = lin(keys[6], hidden, hidden)
    p["o_w"], p["o_b"] = lin(keys[7], hidden, hidden)
    p["fc_w"], p["fc_b"] = lin(keys[8], hidden, num_classes)
    return p


if __name__ == "__main__":
    B, N, in_dim, hidden = 2, 8, 32, 32
    num_heads, num_classes, k_top = 4, 2, 2

    key = jax.random.PRNGKey(0)
    kx, kp = jax.random.split(key)
    x = jax.random.normal(kx, (B, N, in_dim), jnp.float32)
    params = init_params(kp, in_dim, hidden, num_classes)

    out = fr_mil_forward(x, params, num_heads=num_heads, k_top=k_top)
    logits = jax.block_until_ready(out["logits"])

    ref = fr_mil_reference(x, params, num_heads=num_heads, k_top=k_top)["logits"]
    assert logits.shape == (B, num_classes)
    np.testing.assert_allclose(np.asarray(logits), np.asarray(ref), rtol=5e-3, atol=5e-3)

    print("KERNEL_OK")
</pallas_src>

<mosaic_0001>
module attributes {stable_mosaic.version = 11 : i64} {
  func.func @_feature_enc_kernel(%arg0: i32, %arg1: memref<8x32xf32, #tpu.memory_space<vmem>>, %arg2: memref<32x32xbf16, #tpu.memory_space<vmem>>, %arg3: memref<1x32xf32, #tpu.memory_space<vmem>>, %arg4: memref<1x32xf32, #tpu.memory_space<vmem>>, %arg5: memref<1x1xf32, #tpu.memory_space<vmem>>, %arg6: memref<8x32xf32, #tpu.memory_space<vmem>>, %arg7: memref<8x1xf32, #tpu.memory_space<vmem>>) attributes {dimension_semantics = [#tpu.dimension_semantics<parallel>], iteration_bounds = array<i64: 2>, scalar_prefetch = 0 : i64, scratch_operands = 0 : i64, tpu.core_type = #tpu.core_type<tc>, window_params = [{transform_indices = @transform_0, window_bounds = array<i64: 8, 32>}, {pipeline_mode = #tpu.pipeline_mode<synchronous>, transform_indices = @transform_1, window_bounds = array<i64: 32, 32>}, {pipeline_mode = #tpu.pipeline_mode<synchronous>, transform_indices = @transform_2, window_bounds = array<i64: 1, 32>}, {pipeline_mode = #tpu.pipeline_mode<synchronous>, transform_indices = @transform_3, window_bounds = array<i64: 1, 32>}, {pipeline_mode = #tpu.pipeline_mode<synchronous>, transform_indices = @transform_4, window_bounds = array<i64: 1, 1>}, {transform_indices = @transform_5, window_bounds = array<i64: 8, 32>}, {transform_indices = @transform_6, window_bounds = array<i64: 8, 1>}]} {
    %c0 = arith.constant 0 : index
    %c0_0 = arith.constant 0 : index
    %0 = vector.load %arg1[%c0, %c0_0] : memref<8x32xf32, #tpu.memory_space<vmem>>, vector<8x32xf32>
    %1 = arith.truncf %0 : vector<8x32xf32> to vector<8x32xbf16>
    %c0_1 = arith.constant 0 : index
    %c0_2 = arith.constant 0 : index
    %2 = vector.load %arg2[%c0_1, %c0_2] : memref<32x32xbf16, #tpu.memory_space<vmem>>, vector<32x32xbf16>
    %cst = arith.constant dense<0.000000e+00> : vector<8x32xf32>
    %3 = tpu.matmul %1, %2, %cst {dimension_numbers = #tpu.dot_dimension_numbers<[1], [0], [0], [1], [0, 0, 1, 1], [], []>} : vector<8x32xbf16>, vector<32x32xbf16>, vector<8x32xf32> -> vector<8x32xf32>
    %c0_3 = arith.constant 0 : index
    %c0_4 = arith.constant 0 : index
    %4 = vector.load %arg3[%c0_3, %c0_4] : memref<1x32xf32, #tpu.memory_space<vmem>>, vector<1x32xf32>
    %5 = vector.broadcast %4 : vector<1x32xf32> to vector<8x32xf32>
    %6 = arith.addf %3, %5 : vector<8x32xf32>
    %c0_5 = arith.constant 0 : index
    %c0_6 = arith.constant 0 : index
    %7 = vector.load %arg6[%c0_5, %c0_6] : memref<8x32xf32, #tpu.memory_space<vmem>>, vector<8x32xf32>
    tpu.vector_store %arg6[%c0_5, %c0_6], %6 {strides = array<i32>} : memref<8x32xf32, #tpu.memory_space<vmem>>, vector<8x32xf32>,
    %c0_7 = arith.constant 0 : index
    %c0_8 = arith.constant 0 : index
    %8 = vector.load %arg4[%c0_7, %c0_8] : memref<1x32xf32, #tpu.memory_space<vmem>>, vector<1x32xf32>
    %9 = vector.broadcast %8 : vector<1x32xf32> to vector<8x32xf32>
    %10 = arith.mulf %6, %9 : vector<8x32xf32>
    %cst_9 = arith.constant dense<0.000000e+00> : vector<8xf32>
    %11 = vector.multi_reduction <add>, %10, %cst_9 [1] : vector<8x32xf32> to vector<8xf32>
    %12 = vector.shape_cast %11 : vector<8xf32> to vector<8x1xf32>
    %c0_10 = arith.constant 0 : index
    %c0_11 = arith.constant 0 : index
    %13 = vector.load %arg5[%c0_10, %c0_11] : memref<1x1xf32, #tpu.memory_space<vmem>>, vector<1x1xf32>
    %14 = vector.broadcast %13 : vector<1x1xf32> to vector<8x1xf32>
    %15 = arith.addf %12, %14 : vector<8x1xf32>
    %16 = arith.negf %15 : vector<8x1xf32>
    %17 = math.exp %16 : vector<8x1xf32>
    %cst_12 = arith.constant 1.000000e+00 : f32
    %18 = vector.broadcast %cst_12 : f32 to vector<8x1xf32>
    %19 = arith.addf %18, %17 : vector<8x1xf32>
    %20 = arith.divf %18, %19 : vector<8x1xf32>
    %c0_13 = arith.constant 0 : index
    %c0_14 = arith.constant 0 : index
    %21 = vector.load %arg7[%c0_13, %c0_14] : memref<8x1xf32, #tpu.memory_space<vmem>>, vector<8x1xf32>
    tpu.vector_store %arg7[%c0_13, %c0_14], %20 {strides = array<i32>} : memref<8x1xf32, #tpu.memory_space<vmem>>, vector<8x1xf32>,
    return
  }
  func.func @transform_0(%arg0: i32) -> (i32, i32) {
    %c0_i32 = arith.constant 0 : i32
    %c0_i32_0 = arith.constant 0 : i32
    return %arg0, %c0_i32 : i32, i32
  }
  func.func @transform_1(%arg0: i32) -> (i32, i32) {
    %c0_i32 = arith.constant 0 : i32
    %c0_i32_0 = arith.constant 0 : i32
    %c0_i32_1 = arith.constant 0 : i32
    return %c0_i32, %c0_i32_0 : i32, i32
  }
  func.func @transform_2(%arg0: i32) -> (i32, i32) {
    %c0_i32 = arith.constant 0 : i32
    %c0_i32_0 = arith.constant 0 : i32
    %c0_i32_1 = arith.constant 0 : i32
    return %c0_i32, %c0_i32_0 : i32, i32
  }
  func.func @transform_3(%arg0: i32) -> (i32, i32) {
    %c0_i32 = arith.constant 0 : i32
    %c0_i32_0 = arith.constant 0 : i32
    %c0_i32_1 = arith.constant 0 : i32
    return %c0_i32, %c0_i32_0 : i32, i32
  }
  func.func @transform_4(%arg0: i32) -> (i32, i32) {
    %c0_i32 = arith.constant 0 : i32
    %c0_i32_0 = arith.constant 0 : i32
    %c0_i32_1 = arith.constant 0 : i32
    return %c0_i32, %c0_i32_0 : i32, i32
  }
  func.func @transform_5(%arg0: i32) -> (i32, i32) {
    %c0_i32 = arith.constant 0 : i32
    %c0_i32_0 = arith.constant 0 : i32
    return %arg0, %c0_i32 : i32, i32
  }
  func.func @transform_6(%arg0: i32) -> (i32, i32) {
    %c0_i32 = arith.constant 0 : i32
    %c0_i32_0 = arith.constant 0 : i32
    return %arg0, %c0_i32 : i32, i32
  }
}

</mosaic_0001>

<bundles_post_ra>
// kernel: tpu_custom_call.1
= control target key start
LH: loop header
LB: loop body
LE: loop exit
PB: predicated region body
PF: predicated region fallthrough
CT: control target
= control target key end

     0   :  { %s994_s0 = inlined_call_operand.hbm [shape: f32[16,32], index: 0, kind: input, shape index: {}]   ;;  %s995_s1 = inlined_call_operand.hbm [shape: bf16[32,32], index: 1, kind: input, shape index: {}]   ;;  %s996_s2 = inlined_call_operand.vmem [shape: f32[1,32], index: 2, kind: input, shape index: {}]   ;;  %s997_s3 = inlined_call_operand.vmem [shape: f32[1,32], index: 3, kind: input, shape index: {}]   ;;  %s998_s4 = inlined_call_operand.<no memory space> [shape: f32[1,1], index: 4, kind: input, shape index: {}]   ;;  %s999_s5 = inlined_call_operand.hbm [shape: f32[16,32], index: 5, kind: output, shape index: {0}]   ;;  %s1000_s6 = inlined_call_operand.vmem [shape: f32[16,1], index: 6, kind: output, shape index: {1}]  }
   0x1   :  { %v12_v0 = vstv %s998_s4 }
   0x2   :  { %13 = vst [vmem:[#allocation2] sm:$0x1] %v12_v0 }
   0x3   :  { %14 = vsyncpa [#allocation4], 0 }
   0x4   :  { %16 = vsyncpa [#allocation4 + $0x1], 0 }
   0x5   :  { %17 = vsyncpa [#allocation7], 0 }
   0x6   :  { %18 = vsyncpa [#allocation5], 0 }
   0x7   :  { %20 = vsyncpa [#allocation5 + $0x1], 0  ;;  %s793_s23 = smov 0   ;;  %s795_s24 = smov 0  }
   0x8   :  { %s797_s25 = smov 0   ;;  %s799_s26 = smov 0  }
   0x9 LB: > { %s814_s4 = sadd.s32 4294967295, %s746_s26   ;;  %s518_s27 = sadd.s32 4294967294, %s746_s26   ;;  %s746_s26 = sphi %s799_s26, %s1020_s26   ;;  %s742_s25 = sphi %s797_s25, %s1019_s25   ;;  %s738_s24 = sphi %s795_s24, %s1018_s24   ;;  %s734_s23 = sphi %s793_s23, %s1017_s23  }
   0xa   : > { %p46_p0 = scmp.ne.s32.totalorder %s738_s24, %s734_s23  ;;  %p1001_p1 = scmp.eq.s32.totalorder %s814_s4, 0 }
   0xb   : > { %p160_p3 = scmp.eq.s32.totalorder %s518_s27, 1  ;;  %p519_p5 = scmp.ge.s32.totalorder %s746_s26, 1 }
   0xc   : > { %p823_p4 = por %p1001_p1, %p46_p0  ;;  %p193_p7 = scmp.lt.s32.totalorder %s746_s26, 3 }
   0xd   : > { %p828_p6 = por %p160_p3, %p46_p0  ;;  %s748_s7 = smov [#allocation6]  }
   0xe   : > { %s1004_s28 = scalar_select %p823_p4, 1, 0 }
   0xf   : > { %s1005_s29 = scalar_select %p828_p6, 1, 0 }
  0x10   : > { %p833_p8 = pnand %p519_p5, %p193_p7  ;;  %s205_s8 = sshll.u32 %s748_s7, 4  ;;  %s837_s8 = int_to_ptr.vmem [resolvable:$true] %s205_s8 }
  0x11   : > { %s849_s10 = sadd.s32 1, %s746_s26   ;;  %s33_s11 = sadd.s32 1, %s742_s25 }
  0x12   : > { %s1006_s30 = scalar_select %p833_p8, 1, 0 }
  0x13   : > { %p559_p9 = pneg %p833_p8  ;;  %s30_s12 = ssub.s32 %s746_s26, %s849_s10 }
  0x14   : > { %s618_s15 = scalar_lea.hbm %s995_s1, 256 }
  0x15   : > { %p844_p11 = pnand %p559_p9, %p1001_p1  ;;  %p619_p12 = scmp.ne.s32.totalorder %s995_s1, %s618_s15 }
  0x16   : > { %p625_p5 = scmp.lt.u32.totalorder %s618_s15, %s995_s1 }
  0x17   : > { %p620_p13 = pneg %p844_p11 }
  0x19   : > { %p621_p0 = pnand %p620_p13, %p619_p12 }
  0x1b   : > { %p622_p3 = pneg %p621_p0 }
  0x1d   : > { %p627_p7 = pnand %p625_p5, %p622_p3 }
  0x1f   : > { %630 = shalt.err (!%p627_p7)
}
  0x20   : > { %s631_s20 = scalar_lea.vmem %s837_s8, 256  ;;  %p639_p2 = scmp.lt.s32.totalorder %s837_s8, %s837_s8 }
  0x21   : > { %p632_p9 = scmp.ne.s32.totalorder %s837_s8, %s631_s20  ;;  %p640_p6 = scmp.lt.s32.totalorder %s631_s20, %s631_s20 }
  0x23   : > { %p634_p10 = pnand %p632_p9, %p620_p13  ;;  %p641_p4 = por %p640_p6, %p639_p2 }
  0x25   : > { %p635_p1 = pneg %p634_p10 }
  0x27   : > { %p642_p8 = pnand %p641_p4, %p635_p1 }
  0x29   : > { %645 = shalt.err (!%p642_p8)
}
  0x2a   : > { %s749_s21 = smov 64   ;;  %s750_s22 = smov 4  }
  0x2b   : > { %562 = dma.hbm_to_vmem [thread:$0]  (!%p844_p11), %s995_s1, 256, %s837_s8, [#allocation7], %s749_s21, %s749_s21, %s750_s22  }
  0x2c   : > { %p31_p2 = scmp.eq.s32.totalorder %s30_s12, 0  ;;  %p40_p1 = scmp.ne.s32.totalorder %s742_s25, %s738_s24 }
  0x2d   : > { %p41_p4 = scmp.eq.s32.totalorder %s746_s26, 0  ;;  %p572_p6 = scmp.lt.s32.totalorder %s746_s26, 2 }
  0x2e   : > { %s880_s13 = scalar_select %p31_p2, %s742_s25, %s33_s11  }
  0x2f   : > { %p42_p8 = por %p41_p4, %p40_p1  ;;  %p1008_p10 = scmp.eq.s32.totalorder %s814_s4, 1 }
  0x30   : > { %s228_s15 = sand.u32 1, %s742_s25   ;;  %s523_s16 = sshll.u32 %s746_s26, 7 }
  0x31   : > { %p884_p12 = por %p1008_p10, %p40_p1  ;;  %s522_s17 = sshll.u32 %s228_s15, 3 }
  0x32   : > { %s893_s19 = scalar_lea.hbm %s994_s0, %s523_s16  ;;  %s232_s8 = scalar_lea.vmem [#allocation3], %s522_s17 }
  0x33   : > { %s239_s11 = sshll.u32 %s232_s8, 4  ;;  %p895_p11 = pnand %p572_p6, %p42_p8  ;;  %s899_s11 = int_to_ptr.vmem [resolvable:$true] %s239_s11 }
  0x34   : > { %s229_s20 = scalar_lea.sflag [#allocation4], %s228_s15  ;;  %s646_s21 = scalar_lea.hbm %s893_s19, 128 }
  0x35   : > { %p647_p13 = scmp.ne.s32.totalorder %s893_s19, %s646_s21  ;;  %p648_p0 = pneg %p895_p11 }
  0x36   : > { %s651_s7 = scalar_lea.hbm %s994_s0, 256  ;;  %p652_p7 = scmp.lt.u32.totalorder %s893_s19, %s994_s0 }
  0x37   : > { %p649_p3 = pnand %p648_p0, %p647_p13  ;;  %p653_p9 = scmp.lt.u32.totalorder %s651_s7, %s646_s21 }
  0x38   : > { %p655_p1 = scmp.lt.u32.totalorder %s646_s21, %s893_s19 }
  0x39   : > { %p650_p5 = pneg %p649_p3  ;;  %p654_p2 = por %p653_p9, %p652_p7 }
  0x3b   : > { %p656_p4 = por %p655_p1, %p654_p2 }
  0x3d   : > { %p657_p6 = pnand %p656_p4, %p650_p5 }
  0x3f   : > { %660 = shalt.err (!%p657_p6)
}
  0x40   : > { %s661_s15 = scalar_lea.vmem %s899_s11, 128  ;;  %s751_s9 = smov [#allocation3]  }
  0x41   : > { %p662_p8 = scmp.ne.s32.totalorder %s899_s11, %s661_s15  ;;  %s666_s18 = sshll.u32 %s751_s9, 4  ;;  %s667_s18 = int_to_ptr.vmem [resolvable:$false] %s666_s18 }
  0x42   : > { %s668_s8 = scalar_lea.vmem %s667_s18, 256  ;;  %p669_p3 = scmp.lt.s32.totalorder %s899_s11, %s667_s18 }
  0x43   : > { %p664_p10 = pnand %p662_p8, %p648_p0  ;;  %p670_p7 = scmp.lt.s32.totalorder %s668_s8, %s661_s15 }
  0x45   : > { %p665_p13 = pneg %p664_p10  ;;  %p671_p9 = por %p670_p7, %p669_p3 }
  0x47   : > { %p672_p2 = pnand %p671_p9, %p665_p13 }
  0x49   : > { %675 = shalt.err (!%p672_p2)
}
  0x4a   : > { %566 = dma.hbm_to_vmem [thread:$0]  (!%p895_p11), %s893_s19, 128, %s899_s11, %s229_s20  }
  0x4b   : > { %p1011_p5 = scmp.ne.s32.totalorder %s1006_s30, 0 }
  0x4c   : > { %s929_s21 = sand.u32 (!%p1011_p5), 1, %s738_s24   ;;  %p1012_p0 = scmp.ne.s32.totalorder (!%p1011_p5), %s1004_s28, 0 }
  0x4d   : > { %248 = sbr.rel (%p1011_p5) target bundleno = 485 (0x1e5), region = 40  ;;  %s525_s22 = sshll.u32 (!%p1011_p5), %s929_s21, 3 }
  0x4e   : > { %s251_s27 = scalar_lea.sflag (!%p1011_p5), [#allocation4], %s929_s21  ;;  %s254_s7 = scalar_lea.vmem (!%p1011_p5), [#allocation3], %s525_s22 }
  0x54   : > { %721 = dma.done.wait (%p1012_p0), %s251_s27, 128  }
  0x55   : > { %723 = vsyncadd (%p1012_p0), %s251_s27, 4294967168  ;;  %p1013_p1 = scmp.eq.s32.totalorder %s814_s4, 0 }
  0x57   : > { %725 = dma.done.wait (%p1013_p1), [#allocation7], 256   ;;  %p1014_p11 = pmov %p1013_p1 }
  0x58   : > { %v752_v1 = vmov 0.0   ;;  %vm753_vm0 = vmmov 0   ;;  %v612_v2 = vld [vmem:[#allocation6] sm:$0xff]   ;;  %v613_v3 = vld [vmem:[#allocation6 + $0x8] sm:$0xff]   ;;  %v296_v4 = vld [vmem:[%s254_s7] sm:$0xff]  ;;  %vm321_vm1 = vcmask 261120  }
  0x59   : > { %727 = vsyncadd (%p1014_p11), [#allocation7], 4294967040  ;;  %543 = vmatprep.subr.bf16.mxu0 %v752_v1  ;;  %547 = vmatprep.mubr.msk.bf16.mxu0 %vm753_vm0, %v752_v1  ;;  %v297_v5 = vpack.c.bf16 %v296_v4, %v296_v4  ;;  %v529_v6 = vld [vmem:[%s996_s2] ss:$0 sm:$0xff]  ;;  %s284_s12 = scalar_lea.vmem [#allocation8], %s525_s22  ;;  %s537_s20 = sshll.u32 %s814_s4, 7 }
  0x5a   : > { %544 = vmatpush3.bf16.msra.mxu0 %v612_v2  ;;  %v533_v8 = vld [vmem:[%s997_s3] ss:$0 sm:$0xff]  ;;  %s411_s16 = sshll.u32 %s284_s12, 4  ;;  %s951_s9 = scalar_lea.hbm %s999_s5, %s537_s20  ;;  %s412_s16 = int_to_ptr.vmem [resolvable:$true] %s411_s16 }
  0x5b   : > { %545 = vmatprep.subr.bf16.mxu0 %v752_v1  ;;  %s394_s18 = scalar_lea.sflag [#allocation5], %s929_s21  ;;  %s676_s8 = scalar_lea.vmem %s412_s16, 128 }
  0x5c   : > { %p677_p4 = scmp.ne.s32.totalorder %s412_s16, %s676_s8  ;;  %s754_s27 = smov [#allocation8]  }
  0x5d   : > { %s680_s7 = sshll.u32 %s754_s27, 4  ;;  %s681_s7 = int_to_ptr.vmem [resolvable:$false] %s680_s7 }
  0x5e   : > { %546 = vmatpush3.bf16.msra.mxu0 %v613_v3  ;;  %p678_p6 = pnand %p677_p4, %p884_p12  ;;  %s682_s22 = scalar_lea.vmem %s681_s7, 256 }
  0x5f   : > { %p683_p10 = scmp.lt.s32.totalorder %s412_s16, %s681_s7  ;;  %p684_p13 = scmp.lt.s32.totalorder %s682_s22, %s676_s8 }
  0x60   : > { %p679_p8 = pneg %p678_p6 }
  0x61   : > { %548 = vmatmul.mubr.msk.bf16.vlgmr.msra.gmra.mrb[0].mxu0 %vm321_vm1, %v297_v5  ;;  %p685_p3 = por %p684_p13, %p683_p10 }
  0x63   : > { %p686_p7 = pnand %p685_p3, %p679_p8 }
 0x134   : > { %v359_v7 = vpop.f32.mrb[0].mxu0 }
 0x135   : > { %v360_v9 = vadd.f32 %v529_v6, %v359_v7  ;;  %v549_v10 = vpop.f32.mrb[1].mxu0 }
 0x136   : > { %v362_v11 = vpop.f32.mrb[2].mxu0 }
 0x137   : > { %v550_v12 = vpop.f32.mrb[3].mxu0  ;;  %v373_v13 = vmul.f32 %v533_v8, %v360_v9  ;;  %365 = vst.msk [vmem:[%s284_s12] sm:$0xff] %vm321_vm1, %v360_v9 }
 0x139   : > { %v374_v14 = vsel %vm321_vm1, %v373_v13, 0.0 }
 0x13a   : > { %375 = vadd.xlane.f32.xlu0 %v374_v14 }
 0x13b   : > { %689 = shalt.err (!%p686_p7)
}
 0x13c   : > { %s690_s21 = scalar_lea.hbm %s951_s9, 128  ;;  %s694_s19 = scalar_lea.hbm %s999_s5, 256 }
 0x13d   : > { %p691_p9 = scmp.ne.s32.totalorder %s951_s9, %s690_s21  ;;  %p695_p0 = scmp.lt.u32.totalorder %s951_s9, %s999_s5 }
 0x13e   : > { %p696_p1 = scmp.lt.u32.totalorder %s694_s19, %s690_s21  ;;  %p698_p4 = scmp.lt.u32.totalorder %s690_s21, %s951_s9 }
 0x13f   : > { %p692_p2 = pnand %p691_p9, %p884_p12 }
 0x140   : > { %p697_p11 = por %p696_p1, %p695_p0 }
 0x141   : > { %p693_p5 = pneg %p692_p2 }
 0x142   : > { %p699_p6 = por %p698_p4, %p697_p11 }
 0x144   : > { %p700_p8 = pnand %p699_p6, %p693_p5 }
 0x146   : > { %703 = shalt.err (!%p700_p8)
}
 0x147   : > { %557 = dma.vmem_to_hbm [thread:$0]  (%p884_p12), %s412_s16, 128, %s951_s9, %s394_s18   ;;  %v534_v15 = vld [vmem:[#allocation2] ss:$0 sm:$0xff]  ;;  %vm391_vm2 = vcmask 7168  }
 0x148   : > { %p291_p10 = scmp.lt.s32.totalorder %s814_s4, 1 }
 0x14a   : > { %s1022_s4 = smov (!%p291_p10, %s814_s4), 1 }
 0x14b   : > { %s528_s20 = sshll.u32 %s1022_s4, 3 }
 0x14c   : > { %s294_s8 = scalar_lea.vmem %s1000_s6, %s528_s20 }
 0x1c7   : > { %v376_v16 = vpop.xlane.xlu0 %375 }
 0x1c8   : > { %v384_v17 = vadd.f32 %v534_v15, %v376_v16 }
 0x1ca   : > { %v535_v18 = vmul.f32 -1.442695, %v384_v17 }
 0x1cc   : > { %614 = vpow2.f32 %v535_v18 }
 0x1d6   : > { %v615_v19 = vpop.eup %614 }
 0x1d7   : > { %v388_v20 = vadd.f32 1.0, %v615_v19 }
 0x1d9   : > { %616 = vrcp.f32 %v388_v20 }
 0x1e3   : > { %v617_v21 = vpop.eup %616 }
 0x1e4   : > { %392 = vst.msk [vmem:[%s294_s8] sm:$0xff] %vm391_vm2, %v617_v21 }
 0x1e5 PF: > { %s426_s14 = sand.u32 1, %s734_s23   ;;  %p1015_p12 = scmp.ne.s32.totalorder %s1005_s29, 0 }
 0x1e6   : > { %p1016_p13 = scmp.ge.s32.totalorder %s746_s26, 2  ;;  %s427_s16 = scalar_lea.sflag [#allocation5], %s426_s14 }
 0x1e8   : > { %p568_p3 = pnand %p1016_p13, %p1015_p12 }
 0x1ea   : > { %729 = dma.done.wait (!%p568_p3), %s427_s16, 128  }
 0x1eb   : > { %731 = vsyncadd (!%p568_p3), %s427_s16, 4294967168  ;;  %p23_p7 = scmp.ge.s32.totalorder %s849_s10, 4   ;;  %s1017_s23 = smov %s738_s24 }
 0x1ec   : > { %s1018_s24 = smov %s742_s25  ;;  %s1019_s25 = smov %s880_s13 }
 0x1ed   : > { %s1020_s26 = smov %s849_s10  ;;  %25 = sbr.rel (!%p23_p7) target bundleno = 9 (0x9), region = 101 }
 0x1f4   :  { %439 = vsyncpa [#allocation4], 1 }
 0x1f5   :  { %441 = vsyncpa [#allocation4 + $0x1], 1 }
 0x1f6   :  { %442 = vsyncpa [#allocation7], 1 }
 0x1f7   :  { %443 = vsyncpa [#allocation5], 1 }
 0x1f8   :  { %445 = vsyncpa [#allocation5 + $0x1], 1 }

</bundles_post_ra>
